<compile_context>
chip_gen: v7x
topology: tpu7x:2x2x1
jax: 0.10.0
libtpu: 0.0.40
codegen_flags: <defaults>
</compile_context>

<pallas_src>
import functools

import jax
import jax.numpy as jnp
from jax import lax
from jax.experimental import pallas as pl
from jax.experimental.pallas import tpu as pltpu

_LANE = 128
_SUBLANE = 8
_MAX_TILE_ROWS = 8192        # 8192 x 128 x 4B = 4 MiB per f32 input block
_CHUNK_ROWS = 512            # in-kernel sub-chunk: bounds live VMEM temporaries
_MIN_EXACT_TILE_ROWS = 2048  # smallest "exact divisor" tile we accept (1 MiB f32)
_OUT_LANES = 3 * _LANE       # [ sum(p)+sum(t) | sum(p*t) | sum(bce) ]
_PAD_LOGIT = -1.0e4          # sentinel pad: p=0, p*t=0, p+t=0, bce=0 exactly


def _dice_bce_partial_kernel(x_ref, t_ref, out_ref, *, tile_r, chunk_r):
    """Per-block partial sums, written as one lane-dense (8, 384) tile."""

    def chunk_sums(base, nrows):
        x = x_ref[pl.ds(base, nrows), :].astype(jnp.float32)
        t = t_ref[pl.ds(base, nrows), :].astype(jnp.float32)
        # Numerically stable sigmoid / BCE: one exp + one log1p per element.
        #   e          = exp(-|x|)               in (0, 1], never overflows
        #   p          = sigmoid(x)
        #   log(p)     = min(x, 0)  - log1p(e)
        #   log(1 - p) = min(-x, 0) - log1p(e)
        # PyTorch's F.binary_cross_entropy clamps the logs at -100; keep that.
        e = jnp.exp(-jnp.abs(x))
        log1pe = jnp.log1p(e)
        inv = 1.0 / (1.0 + e)
        p = jnp.where(x >= 0, inv, e * inv)
        log_p = jnp.maximum(jnp.minimum(x, 0.0) - log1pe, -100.0)
        log_1mp = jnp.maximum(jnp.minimum(-x, 0.0) - log1pe, -100.0)
        bce = -(log_1mp + t * (log_p - log_1mp))   # factored: no (1-t) materialized

        def fold(v):  # (nrows, 128) -> (8, 128) partial sums, pure VPU adds
            return v.reshape(-1, _SUBLANE, _LANE).sum(axis=0)

        return fold(p + t), fold(p * t), fold(bce)

    n_full = tile_r // chunk_r
    rem = tile_r - n_full * chunk_r

    if n_full == 1 and rem == 0:
        pt, prod, bce = chunk_sums(0, chunk_r)
    else:
        zero = jnp.zeros((_SUBLANE, _LANE), jnp.float32)

        def body(j, acc):
            base = pl.multiple_of(j * chunk_r, chunk_r)
            c_pt, c_prod, c_bce = chunk_sums(base, chunk_r)
            return (acc[0] + c_pt, acc[1] + c_prod, acc[2] + c_bce)

        pt, prod, bce = lax.fori_loop(0, n_full, body, (zero, zero, zero))
        if rem:
            c_pt, c_prod, c_bce = chunk_sums(n_full * chunk_r, rem)
            pt, prod, bce = pt + c_pt, prod + c_prod, bce + c_bce

    # One merged lane-dense output block => a single output DMA per grid step.
    out_ref[:, 0 * _LANE:1 * _LANE] = pt
    out_ref[:, 1 * _LANE:2 * _LANE] = prod
    out_ref[:, 2 * _LANE:3 * _LANE] = bce


def _pick_tiling(rows):
    """Choose (tile_r, num_blocks); kernel covers the first num_blocks*tile_r rows."""
    if rows >= _SUBLANE and rows % _SUBLANE == 0:
        # Try a tile that exactly divides rows -> no leftover tail at all.
        m = rows // _SUBLANE
        for cand in range(min(m, _MAX_TILE_ROWS // _SUBLANE), 0, -1):
            if m % cand == 0:
                tile_r = _SUBLANE * cand
                if tile_r == rows or tile_r >= _MIN_EXACT_TILE_ROWS:
                    return tile_r, rows // tile_r
                break
    # Otherwise: big aligned blocks over a prefix; leftover rows go to the
    # tiny jnp tail in the wrapper.
    tile_r = min(_MAX_TILE_ROWS, (rows // _SUBLANE) * _SUBLANE)
    if tile_r == 0:
        return 0, 0
    return tile_r, rows // tile_r


def _sums_jnp(x, t):
    """Tail / fallback path (tiny): same math, plain jnp, float32."""
    x = x.astype(jnp.float32)
    t = t.astype(jnp.float32)
    p = jax.nn.sigmoid(x)
    log_p = jnp.maximum(jax.nn.log_sigmoid(x), -100.0)
    log_1mp = jnp.maximum(jax.nn.log_sigmoid(-x), -100.0)
    bce = -(log_1mp + t * (log_p - log_1mp))
    return jnp.sum(p) + jnp.sum(t), jnp.sum(p * t), jnp.sum(bce)


def dice_bce_loss(inputs, targets, smooth=1.0):
    """DiceBCELoss forward: inputs are logits, targets in [0, 1]. Scalar f32."""
    smooth = float(smooth)
    n = int(inputs.size)
    x = inputs.reshape(-1)
    t = targets.reshape(-1)

    if n % _LANE != 0:
        # Truly ragged size: one-time sentinel pad to whole (8,128) tiles.
        # Padded elements contribute exactly 0 to every partial sum
        # (p=0, t=0, bce=0), so the kernel needs no mask.
        pad = (-n) % (_SUBLANE * _LANE)
        x = jnp.pad(x, (0, pad), constant_values=_PAD_LOGIT)
        t = jnp.pad(t, (0, pad), constant_values=0)

    rows = x.shape[0] // _LANE
    tile_r, num_blocks = _pick_tiling(rows)

    pt_sum = jnp.float32(0.0)   # sum(p) + sum(t)
    inter = jnp.float32(0.0)    # sum(p * t)
    bce_sum = jnp.float32(0.0)  # sum(per-element BCE)

    if num_blocks > 0:
        x2d = x.reshape(rows, _LANE)   # zero-copy lane-dense view
        t2d = t.reshape(rows, _LANE)
        chunk_r = min(tile_r, _CHUNK_ROWS)

        kernel = functools.partial(_dice_bce_partial_kernel,
                                   tile_r=tile_r, chunk_r=chunk_r)

        # 2 pipeline buffers per input block + headroom for in-kernel temporaries.
        in_block_bytes = tile_r * _LANE * (x2d.dtype.itemsize + t2d.dtype.itemsize)
        vmem_limit = int(min(max(2 * in_block_bytes + (12 << 20), 16 << 20),
                             48 << 20))

        part = pl.pallas_call(
            kernel,
            out_shape=jax.ShapeDtypeStruct((num_blocks * _SUBLANE, _OUT_LANES),
                                           jnp.float32),
            grid_spec=pltpu.PrefetchScalarGridSpec(
                num_scalar_prefetch=0,
                grid=(num_blocks,),
                in_specs=[
                    pl.BlockSpec((tile_r, _LANE), lambda i: (i, 0)),
                    pl.BlockSpec((tile_r, _LANE), lambda i: (i, 0)),
                ],
                out_specs=pl.BlockSpec((_SUBLANE, _OUT_LANES), lambda i: (i, 0)),
            ),
            compiler_params=pltpu.CompilerParams(
                dimension_semantics=("parallel",),
                vmem_limit_bytes=vmem_limit,
            ),
        )(x2d, t2d)

        pt_sum = pt_sum + jnp.sum(part[:, 0 * _LANE:1 * _LANE])
        inter = inter + jnp.sum(part[:, 1 * _LANE:2 * _LANE])
        bce_sum = bce_sum + jnp.sum(part[:, 2 * _LANE:3 * _LANE])

    rows_main = num_blocks * tile_r
    tail_elems = x.shape[0] - rows_main * _LANE
    if tail_elems:
        # Leftover (< one tile) handled in plain jnp — negligible HBM traffic.
        t_pt, t_inter, t_bce = _sums_jnp(x[rows_main * _LANE:],
                                         t[rows_main * _LANE:])
        pt_sum = pt_sum + t_pt
        inter = inter + t_inter
        bce_sum = bce_sum + t_bce

    dice_loss = 1.0 - (2.0 * inter + smooth) / (pt_sum + smooth)
    bce_mean = bce_sum / n
    return bce_mean + dice_loss


def _dice_bce_ref(inputs, targets, smooth=1.0):
    """Pure-JAX reference mirroring the PyTorch module."""
    p = jax.nn.sigmoid(inputs.astype(jnp.float32)).reshape(-1)
    t = targets.astype(jnp.float32).reshape(-1)
    inter = jnp.sum(p * t)
    dice = 1.0 - (2.0 * inter + smooth) / (jnp.sum(p) + jnp.sum(t) + smooth)
    bce = jnp.mean(-(t * jnp.maximum(jnp.log(p), -100.0)
                     + (1.0 - t) * jnp.maximum(jnp.log(1.0 - p), -100.0)))
    return bce + dice


if __name__ == "__main__":
    key = jax.random.PRNGKey(0)
    k1, k2 = jax.random.split(key)
    # Small NCHW logits and binary targets.
    B, C, H, W = 2, 4, 16, 16
    inputs = jax.random.normal(k1, (B, C, H, W), dtype=jnp.float32)
    targets = (jax.random.uniform(k2, (B, C, H, W)) > 0.5).astype(jnp.float32)

    loss = jax.block_until_ready(dice_bce_loss(inputs, targets))
    ref = jax.block_until_ready(_dice_bce_ref(inputs, targets))
    assert jnp.allclose(loss, ref, rtol=1e-5, atol=1e-5), (loss, ref)
    print("KERNEL_OK")
</pallas_src>

<mosaic_0001>
module attributes {stable_mosaic.version = 11 : i64} {
  func.func @_dice_bce_partial_kernel(%arg0: i32, %arg1: memref<16x128xf32, #tpu.memory_space<vmem>>, %arg2: memref<16x128xf32, #tpu.memory_space<vmem>>, %arg3: memref<8x384xf32, #tpu.memory_space<vmem>>) attributes {dimension_semantics = [#tpu.dimension_semantics<parallel>], iteration_bounds = array<i64: 1>, scalar_prefetch = 0 : i64, scratch_operands = 0 : i64, tpu.core_type = #tpu.core_type<tc>, window_params = [{transform_indices = @transform_0, window_bounds = array<i64: 16, 128>}, {transform_indices = @transform_1, window_bounds = array<i64: 16, 128>}, {transform_indices = @transform_2, window_bounds = array<i64: 8, 384>}]} {
    %c0 = arith.constant 0 : index
    %c0_0 = arith.constant 0 : index
    %0 = vector.load %arg1[%c0, %c0_0] : memref<16x128xf32, #tpu.memory_space<vmem>>, vector<16x128xf32>
    %c0_1 = arith.constant 0 : index
    %c0_2 = arith.constant 0 : index
    %1 = vector.load %arg2[%c0_1, %c0_2] : memref<16x128xf32, #tpu.memory_space<vmem>>, vector<16x128xf32>
    %2 = math.absf %0 : vector<16x128xf32>
    %cst = arith.constant 0.000000e+00 : f32
    %3 = vector.broadcast %cst : f32 to vector<16x128xf32>
    %4 = arith.subf %3, %2 : vector<16x128xf32>
    %5 = math.exp %4 : vector<16x128xf32>
    %6 = math.log1p %5 : vector<16x128xf32>
    %cst_3 = arith.constant 1.000000e+00 : f32
    %7 = vector.broadcast %cst_3 : f32 to vector<16x128xf32>
    %8 = arith.addf %7, %5 : vector<16x128xf32>
    %cst_4 = arith.constant 1.000000e+00 : f32
    %9 = vector.broadcast %cst_4 : f32 to vector<16x128xf32>
    %10 = arith.divf %9, %8 : vector<16x128xf32>
    %cst_5 = arith.constant 0.000000e+00 : f32
    %11 = vector.broadcast %cst_5 : f32 to vector<16x128xf32>
    %12 = arith.cmpf oge, %0, %11 : vector<16x128xf32>
    %13 = arith.mulf %5, %10 : vector<16x128xf32>
    %14 = arith.select %12, %10, %13 : vector<16x128xi1>, vector<16x128xf32>
    %cst_6 = arith.constant 0.000000e+00 : f32
    %15 = vector.broadcast %cst_6 : f32 to vector<16x128xf32>
    %16 = arith.minimumf %0, %15 : vector<16x128xf32>
    %17 = arith.subf %16, %6 : vector<16x128xf32>
    %cst_7 = arith.constant -1.000000e+02 : f32
    %18 = vector.broadcast %cst_7 : f32 to vector<16x128xf32>
    %19 = arith.maximumf %17, %18 : vector<16x128xf32>
    %cst_8 = arith.constant 0.000000e+00 : f32
    %20 = vector.broadcast %cst_8 : f32 to vector<16x128xf32>
    %21 = arith.subf %20, %0 : vector<16x128xf32>
    %cst_9 = arith.constant 0.000000e+00 : f32
    %22 = vector.broadcast %cst_9 : f32 to vector<16x128xf32>
    %23 = arith.minimumf %21, %22 : vector<16x128xf32>
    %24 = arith.subf %23, %6 : vector<16x128xf32>
    %cst_10 = arith.constant -1.000000e+02 : f32
    %25 = vector.broadcast %cst_10 : f32 to vector<16x128xf32>
    %26 = arith.maximumf %24, %25 : vector<16x128xf32>
    %27 = arith.subf %19, %26 : vector<16x128xf32>
    %28 = arith.mulf %1, %27 : vector<16x128xf32>
    %29 = arith.addf %26, %28 : vector<16x128xf32>
    %cst_11 = arith.constant 0.000000e+00 : f32
    %30 = vector.broadcast %cst_11 : f32 to vector<16x128xf32>
    %31 = arith.subf %30, %29 : vector<16x128xf32>
    %32 = arith.addf %14, %1 : vector<16x128xf32>
    %33 = vector.shape_cast %32 : vector<16x128xf32> to vector<2x8x128xf32>
    %cst_12 = arith.constant dense<0.000000e+00> : vector<8x128xf32>
    %34 = vector.multi_reduction <add>, %33, %cst_12 [0] : vector<2x8x128xf32> to vector<8x128xf32>
    %35 = arith.mulf %14, %1 : vector<16x128xf32>
    %36 = vector.shape_cast %35 : vector<16x128xf32> to vector<2x8x128xf32>
    %cst_13 = arith.constant dense<0.000000e+00> : vector<8x128xf32>
    %37 = vector.multi_reduction <add>, %36, %cst_13 [0] : vector<2x8x128xf32> to vector<8x128xf32>
    %38 = vector.shape_cast %31 : vector<16x128xf32> to vector<2x8x128xf32>
    %cst_14 = arith.constant dense<0.000000e+00> : vector<8x128xf32>
    %39 = vector.multi_reduction <add>, %38, %cst_14 [0] : vector<2x8x128xf32> to vector<8x128xf32>
    %c0_15 = arith.constant 0 : index
    %c0_16 = arith.constant 0 : index
    %40 = vector.load %arg3[%c0_15, %c0_16] : memref<8x384xf32, #tpu.memory_space<vmem>>, vector<8x128xf32>
    tpu.vector_store %arg3[%c0_15, %c0_16], %34 {strides = array<i32>} : memref<8x384xf32, #tpu.memory_space<vmem>>, vector<8x128xf32>,
    %c0_17 = arith.constant 0 : index
    %c128 = arith.constant 128 : index
    %41 = vector.load %arg3[%c0_17, %c128] : memref<8x384xf32, #tpu.memory_space<vmem>>, vector<8x128xf32>
    tpu.vector_store %arg3[%c0_17, %c128], %37 {strides = array<i32>} : memref<8x384xf32, #tpu.memory_space<vmem>>, vector<8x128xf32>,
    %c0_18 = arith.constant 0 : index
    %c256 = arith.constant 256 : index
    %42 = vector.load %arg3[%c0_18, %c256] : memref<8x384xf32, #tpu.memory_space<vmem>>, vector<8x128xf32>
    tpu.vector_store %arg3[%c0_18, %c256], %39 {strides = array<i32>} : memref<8x384xf32, #tpu.memory_space<vmem>>, vector<8x128xf32>,
    return
  }
  func.func @transform_0(%arg0: i32) -> (i32, i32) {
    %c0_i32 = arith.constant 0 : i32
    %c0_i32_0 = arith.constant 0 : i32
    return %arg0, %c0_i32 : i32, i32
  }
  func.func @transform_1(%arg0: i32) -> (i32, i32) {
    %c0_i32 = arith.constant 0 : i32
    %c0_i32_0 = arith.constant 0 : i32
    return %arg0, %c0_i32 : i32, i32
  }
  func.func @transform_2(%arg0: i32) -> (i32, i32) {
    %c0_i32 = arith.constant 0 : i32
    %c0_i32_0 = arith.constant 0 : i32
    return %arg0, %c0_i32 : i32, i32
  }
}

</mosaic_0001>

<bundles_post_ra>
// kernel: tpu_custom_call.1
= control target key start
LH: loop header
LB: loop body
LE: loop exit
PB: predicated region body
PF: predicated region fallthrough
CT: control target
= control target key end

     0   :  { %7 = vsyncpa [#allocation3], 0  ;;  %s282_s0 = inlined_call_operand.hbm [shape: f32[16,128], index: 0, kind: input, shape index: {}]   ;;  %s283_s1 = inlined_call_operand.hbm [shape: f32[16,128], index: 1, kind: input, shape index: {}]   ;;  %s284_s2 = inlined_call_operand.hbm [shape: f32[8,384], index: 2, kind: output, shape index: {}]  }
   0x1   :  { %8 = vsyncpa [#allocation6], 0 }
   0x2   :  { %9 = vsyncpa [#allocation4], 0  ;;  %s219_s9 = smov [#allocation2]   ;;  %s147_s13 = scalar_lea.hbm %s282_s0, 256 }
   0x3   :  { %s15_s10 = sshll.u32 %s219_s9, 4  ;;  %p148_p0 = scmp.ne.s32.totalorder %s282_s0, %s147_s13  ;;  %s16_s10 = int_to_ptr.vmem [resolvable:$true] %s15_s10 }
   0x4   :  { %p151_p1 = scmp.lt.u32.totalorder %s147_s13, %s282_s0 }
   0x6   :  { %p153_p2 = pnand %p151_p1, %p148_p0 }
   0x8   :  { %156 = shalt.err (!%p153_p2)
}
   0x9   :  { %s157_s18 = scalar_lea.vmem %s16_s10, 256  ;;  %p162_p4 = scmp.lt.s32.totalorder %s16_s10, %s16_s10 }
   0xa   :  { %p158_p3 = scmp.ne.s32.totalorder %s16_s10, %s157_s18  ;;  %p163_p5 = scmp.lt.s32.totalorder %s157_s18, %s157_s18 }
   0xc   :  { %p164_p6 = por %p163_p5, %p162_p4 }
   0xe   :  { %p165_p7 = pnand %p164_p6, %p158_p3 }
  0x10   :  { %168 = shalt.err (!%p165_p7)
}
  0x11   :  { %s220_s19 = smov 128   ;;  %s221_s20 = smov 8  }
  0x12   :  { %21 = dma.hbm_to_vmem [thread:$0]  %s282_s0, 256, %s16_s10, [#allocation3], %s220_s19, %s220_s19, %s221_s20  }
  0x13   :  { %s222_s23 = smov [#allocation5]   ;;  %s169_s27 = scalar_lea.hbm %s283_s1, 256 }
  0x14   :  { %s27_s24 = sshll.u32 %s222_s23, 4  ;;  %p170_p8 = scmp.ne.s32.totalorder %s283_s1, %s169_s27  ;;  %s28_s24 = int_to_ptr.vmem [resolvable:$true] %s27_s24 }
  0x15   :  { %p173_p9 = scmp.lt.u32.totalorder %s169_s27, %s283_s1 }
  0x17   :  { %p175_p10 = pnand %p173_p9, %p170_p8 }
  0x19   :  { %178 = shalt.err (!%p175_p10)
}
  0x1a   :  { %s179_s4 = scalar_lea.vmem %s28_s24, 256  ;;  %p184_p12 = scmp.lt.s32.totalorder %s28_s24, %s28_s24 }
  0x1b   :  { %p180_p11 = scmp.ne.s32.totalorder %s28_s24, %s179_s4  ;;  %p185_p13 = scmp.lt.s32.totalorder %s179_s4, %s179_s4 }
  0x1d   :  { %p186_p0 = por %p185_p13, %p184_p12 }
  0x1f   :  { %p187_p1 = pnand %p186_p0, %p180_p11 }
  0x21   :  { %190 = shalt.err (!%p187_p1)
}
  0x22   :  { %33 = dma.hbm_to_vmem [thread:$0]  %s283_s1, 256, %s28_s24, [#allocation6], %s220_s19, %s220_s19, %s221_s20  }
  0x23   :  { %213 = dma.done.wait [#allocation3], 256  }
  0x24   :  { %214 = vsyncadd [#allocation3], 4294967040 }
  0x25   :  { %215 = dma.done.wait [#allocation6], 256  }
  0x26   :  { %216 = vsyncadd [#allocation6], 4294967040  ;;  %v40_v0 = vld [vmem:[#allocation2] sm:$0xff]  ;;  %v41_v1 = vld [vmem:[#allocation2 + $0x8] sm:$0xff]  ;;  %s223_s1 = smov [#allocation7]  }
  0x27   :  { %v44_v2 = vand.u32 2147483647, %v40_v0  ;;  %v45_v3 = vand.u32 2147483647, %v41_v1  ;;  %v88_v17 = vsub.f32 0.0, %v40_v0  ;;  %v89_v19 = vsub.f32 0.0, %v41_v1 }
  0x28   :  { %vm76_vm0 = vcmp.ge.f32.partialorder %v40_v0, 0.0  ;;  %vm77_vm1 = vcmp.ge.f32.partialorder %v41_v1, 0.0  ;;  %v82_v24 = vmin.f32 %v40_v0, 0.0  ;;  %v83_v25 = vmin.f32 %v41_v1, 0.0  ;;  %v42_v32 = vld [vmem:[#allocation5] sm:$0xff]  ;;  %v43_v36 = vld [vmem:[#allocation5 + $0x8] sm:$0xff] }
  0x29   :  { %v46_v4 = vsub.f32 0.0, %v44_v2  ;;  %v47_v5 = vsub.f32 0.0, %v45_v3  ;;  %v90_v30 = vmin.f32 %v88_v17, 0.0  ;;  %v91_v35 = vmin.f32 %v89_v19, 0.0  ;;  %s120_s6 = sshll.u32 %s223_s1, 4  ;;  %s121_s6 = int_to_ptr.vmem [resolvable:$true] %s120_s6 }
  0x2a   :  { %s191_s7 = scalar_lea.vmem %s121_s6, 384  ;;  %p196_p3 = scmp.lt.s32.totalorder %s121_s6, %s121_s6 }
  0x2b   :  { %v48_v6 = vmul.f32 1.442695, %v46_v4  ;;  %v50_v7 = vmul.f32 1.442695, %v47_v5  ;;  %p192_p2 = scmp.ne.s32.totalorder %s121_s6, %s191_s7  ;;  %p197_p4 = scmp.lt.s32.totalorder %s191_s7, %s191_s7 }
  0x2d   :  { %135 = vpow2.f32 %v48_v6  ;;  %p198_p5 = por %p197_p4, %p196_p3 }
  0x2e   :  { %137 = vpow2.f32 %v50_v7 }
  0x2f   :  { %p199_p6 = pnand %p198_p5, %p192_p2 }
  0x37   :  { %v136_v8 = vpop.eup %135 }
  0x38   :  { %v138_v9 = vpop.eup %137  ;;  %v52_v10 = vadd.f32 1.0, %v136_v8  ;;  %v55_v12 = vmul.f32 -0.5, %v136_v8  ;;  %v58_v15 = vand.u32 2147483647, %v136_v8 }
  0x39   :  { %v61_v11 = vadd.f32 1.0, %v138_v9  ;;  %v64_v13 = vmul.f32 -0.5, %v138_v9  ;;  %v67_v18 = vand.u32 2147483647, %v138_v9 }
  0x3a   :  { %139 = vrcp.f32 %v52_v10  ;;  %v56_v14 = vadd.f32 1.0, %v55_v12  ;;  %vm263_vm2 = vcmp.lt.f32.partialorder %v58_v15, 0.0004427343 }
  0x3b   :  { %141 = vrcp.f32 %v61_v11  ;;  %v65_v16 = vadd.f32 1.0, %v64_v13  ;;  %vm68_vm3 = vcmp.lt.f32.partialorder %v67_v18, 0.0004427343 }
  0x3c   :  { %143 = vlog2.f32 %v52_v10  ;;  %v57_v23 = vmul.f32 %v136_v8, %v56_v14 }
  0x3d   :  { %145 = vlog2.f32 %v61_v11  ;;  %v66_v29 = vmul.f32 %v138_v9, %v65_v16 }
  0x44   :  { %v140_v20 = vpop.eup %139 }
  0x45   :  { %v142_v21 = vpop.eup %141  ;;  %v78_v22 = vmul.f32 %v140_v20, %v136_v8 }
  0x46   :  { %v144_v26 = vpop.eup %143  ;;  %v79_v27 = vmul.f32 %v142_v21, %v138_v9 }
  0x47   :  { %v146_v31 = vpop.eup %145  ;;  %v80_v33 = vsel %vm76_vm0, %v140_v20, %v78_v22  ;;  %v54_v34 = vmul.f32 0.6931472, %v144_v26 }
  0x48   :  { %v81_v37 = vsel %vm77_vm1, %v142_v21, %v79_v27  ;;  %v104_v38 = vadd.f32 %v80_v33, %v42_v32  ;;  %v107_v39 = vmul.f32 %v80_v33, %v42_v32  ;;  %v63_v40 = vmul.f32 0.6931472, %v146_v31 }
  0x49   :  { %v105_v41 = vadd.f32 %v81_v37, %v43_v36  ;;  %v108_v42 = vmul.f32 %v81_v37, %v43_v36  ;;  %v60_v43 = vsel %vm263_vm2, %v57_v23, %v54_v34 }
  0x4a   :  { %v69_v44 = vsel %vm68_vm3, %v66_v29, %v63_v40  ;;  %v84_v45 = vsub.f32 %v82_v24, %v60_v43  ;;  %v92_v46 = vsub.f32 %v90_v30, %v60_v43 }
  0x4b   :  { %v106_v47 = vadd.f32 %v105_v41, %v104_v38  ;;  %v109_v48 = vadd.f32 %v108_v42, %v107_v39  ;;  %v85_v49 = vsub.f32 %v83_v25, %v69_v44  ;;  %v93_v50 = vsub.f32 %v91_v35, %v69_v44 }
  0x4c   :  { %v86_v51 = vmax.f32 %v84_v45, -100.0  ;;  %v94_v52 = vmax.f32 %v92_v46, -100.0 }
  0x4d   :  { %111 = vst [vmem:[#allocation7] sm:$0xff] %v106_v47  ;;  %112 = vst [vmem:[#allocation7 + $0x8] sm:$0xff] %v109_v48  ;;  %v87_v53 = vmax.f32 %v85_v49, -100.0  ;;  %v95_v54 = vmax.f32 %v93_v50, -100.0 }
  0x4e   :  { %v96_v55 = vsub.f32 %v86_v51, %v94_v52 }
  0x4f   :  { %v97_v56 = vsub.f32 %v87_v53, %v95_v54 }
  0x50   :  { %v98_v57 = vmul.f32 %v96_v55, %v42_v32 }
  0x51   :  { %v99_v58 = vmul.f32 %v97_v56, %v43_v36 }
  0x52   :  { %v100_v59 = vadd.f32 %v98_v57, %v94_v52 }
  0x53   :  { %v101_v60 = vadd.f32 %v99_v58, %v95_v54 }
  0x54   :  { %v102_v61 = vsub.f32 0.0, %v100_v59 }
  0x55   :  { %v103_v62 = vsub.f32 0.0, %v101_v60 }
  0x57   :  { %v110_v63 = vadd.f32 %v103_v62, %v102_v61 }
  0x59   :  { %113 = vst [vmem:[#allocation7 + $0x10] sm:$0xff] %v110_v63 }
  0x5a   :  { %202 = shalt.err (!%p199_p6)
}
  0x5b   :  { %s203_s10 = scalar_lea.hbm %s284_s2, 384 }
  0x5c   :  { %p204_p7 = scmp.ne.s32.totalorder %s284_s2, %s203_s10  ;;  %p207_p8 = scmp.lt.u32.totalorder %s203_s10, %s284_s2 }
  0x5e   :  { %p209_p9 = pnand %p207_p8, %p204_p7 }
  0x60   :  { %212 = shalt.err (!%p209_p9)
}
  0x61   :  { %123 = dma.vmem_to_hbm [thread:$0]  %s121_s6, 384, %s284_s2, [#allocation4]  }
  0x62   :  { %217 = dma.done.wait [#allocation4], 384  }
  0x63   :  { %218 = vsyncadd [#allocation4], 4294966912 }
  0x64   :  { %127 = vsyncpa [#allocation3], 1 }
  0x65   :  { %128 = vsyncpa [#allocation6], 1 }
  0x66   :  { %129 = vsyncpa [#allocation4], 1 }

</bundles_post_ra>
